<compile_context>
chip_gen: v5e
topology: v5e:2x2
jax: 0.10.0
libtpu: 0.0.40
codegen_flags: <defaults>
</compile_context>

<pallas_src>
import functools

import jax
import jax.numpy as jnp
from jax import lax
from jax.experimental import pallas as pl
from jax.experimental.pallas import tpu as pltpu

HIDDE_SIZE_OUT = 8   # matches `hidde_size_out = 8` in the PyTorch file


def _round_up(n, m):
    return (n + m - 1) // m * m


def _cdiv(a, b):
    return -(-a // b)


def _grid_plan(B):
    """Pick (TB, n_steps): >= 2 steps (v7x megacore sharding), TB capped so the
    per-step footprint (inputs, output, intermediates) stays a few hundred KB."""
    TB_MAX = 2048
    if B <= 8:
        return 8, 1
    n_steps = max(2, 2 * _cdiv(_cdiv(B, TB_MAX), 2))   # even step count
    TB = _round_up(_cdiv(B, n_steps), 8)
    return TB, n_steps


def critic_kernel(x_ref, w1_ref, w2_ref, b2_ref, w3o_ref, embo_ref, out_ref,
                  *, discr_size):
    x = x_ref[...]                                       # [TB, 4] f32, col 2 = idx
    tb = x.shape[0]
    dpad = embo_ref.shape[0]

    # Discrete index straight from column 2 (VPU cast + clip; PyTorch's
    # nn.Embedding would raise on OOB — we clamp instead).
    idx = jnp.clip(x[:, 2:3], 0.0, float(discr_size - 1)).astype(jnp.int32)

    # Force column 2 to 1.0 so row 2 of w1 carries the folded b1
    # (columns 0,1,3 are the original cat(x[:,0:2], x[:,3:4]) inputs).
    col = lax.broadcasted_iota(jnp.int32, x.shape, 1)
    x1 = jnp.where(col == 2, jnp.float32(1.0), x)

    # MLP trunk.  First matmul: column select + b1 already folded into w1.
    h = jnp.dot(x1, w1_ref[...], preferred_element_type=jnp.float32)
    h = jnp.maximum(h, 0.0)
    # H x H matmul in bf16 operands (MXU-native), f32 accumulation.
    h = jnp.dot(h.astype(w2_ref.dtype), w2_ref[...],
                preferred_element_type=jnp.float32) + b2_ref[...]
    h = jnp.maximum(h, 0.0)

    # Tail already folded: w3o = w3 @ wo  ->  [H, out_size]
    out_conti = jnp.dot(h, w3o_ref[...], preferred_element_type=jnp.float32)

    # Embedding gather as one-hot matmul; embo = emb @ wo + (b3 @ wo + bo) —
    # the output bias rides along because every one-hot row sums to 1.
    iota = lax.broadcasted_iota(jnp.int32, (tb, dpad), 1)
    onehot = (iota == idx).astype(jnp.float32)           # [TB, dpad]
    out_discr = jnp.dot(onehot, embo_ref[...],
                        preferred_element_type=jnp.float32)

    out_ref[...] = (out_conti + out_discr).astype(out_ref.dtype)


def fold_params(params, discr_size):
    """One-time algebraic folding of the tiny parameter set.

    Call once (outside the per-step inference loop) and reuse the result."""
    w1, b1 = params["w1"], params["b1"]          # [3, H], [1, H]
    w2, b2 = params["w2"], params["b2"]          # [H, H], [1, H]
    w3, b3 = params["w3"], params["b3"]          # [H, 8], [1, 8]
    emb = params["emb"]                          # [D, 8]
    wo, bo = params["wo"], params["bo"]          # [8, out], [1, out]
    H = w1.shape[1]
    out_size = wo.shape[1]

    # Column selection + input bias folded into a [4, H] weight:
    # rows 0,1 <- cont weights, row 2 <- b1 (kernel forces x[:,2]=1), row 3 <- action.
    w1f = jnp.zeros((4, H), jnp.float32)
    w1f = w1f.at[0].set(w1[0]).at[1].set(w1[1]).at[2].set(b1[0]).at[3].set(w1[2])

    # Tail fold: (relu2 @ w3 + b3 + emb[idx]) @ wo + bo
    #          = relu2 @ (w3 @ wo) + onehot @ (emb @ wo + b3 @ wo + bo)
    w3o = (w3 @ wo).astype(jnp.float32)                      # [H, out]
    embo = (emb @ wo + b3 @ wo + bo).astype(jnp.float32)     # [D, out]

    dpad = max(8, _round_up(discr_size, 8))                  # sublane-aligned rows
    embo_p = jnp.zeros((dpad, out_size), jnp.float32).at[:discr_size].set(embo)

    return {
        "w1f": w1f,                          # f32 [4, H]  (b1 in row 2)
        "w2": w2.astype(jnp.bfloat16),       # bf16 [H, H] (MXU-native operand)
        "b2": b2.astype(jnp.float32),        # f32 [1, H]
        "w3o": w3o,                          # f32 [H, out]
        "embo": embo_p,                      # f32 [dpad, out] (bias folded in)
    }


@functools.partial(jax.jit, static_argnames=("discr_size",))
def critic_net_forward(x, fp, *, discr_size):
    """x: [B, 4] float32 (col 2 = discrete index); fp: output of fold_params.
    Returns [B, out_size]."""
    B = x.shape[0]
    H = fp["w2"].shape[0]
    dpad, out_size = fp["embo"].shape

    TB, n_steps = _grid_plan(B)
    B_pad = TB * n_steps
    if B_pad != B:
        x = jnp.pad(x, ((0, B_pad - B), (0, 0)))

    kernel = functools.partial(critic_kernel, discr_size=discr_size)
    out = pl.pallas_call(
        kernel,
        out_shape=jax.ShapeDtypeStruct((B_pad, out_size), jnp.float32),
        grid_spec=pltpu.PrefetchScalarGridSpec(
            num_scalar_prefetch=0,
            grid=(n_steps,),
            in_specs=[
                pl.BlockSpec((TB, 4), lambda i: (i, 0)),           # x (col 2 = idx)
                pl.BlockSpec((4, H), lambda i: (0, 0)),            # w1f (b1 folded)
                pl.BlockSpec((H, H), lambda i: (0, 0)),            # w2 (bf16)
                pl.BlockSpec((1, H), lambda i: (0, 0)),            # b2
                pl.BlockSpec((H, out_size), lambda i: (0, 0)),     # w3 @ wo
                pl.BlockSpec((dpad, out_size), lambda i: (0, 0)),  # emb@wo + bias
            ],
            out_specs=pl.BlockSpec((TB, out_size), lambda i: (i, 0)),
        ),
        compiler_params=pltpu.CompilerParams(
            dimension_semantics=("parallel",)),   # shards steps across TCs on v7x
    )(x, fp["w1f"], fp["w2"], fp["b2"], fp["w3o"], fp["embo"])

    # Only a cheap (narrow) row-slice remains when the batch was padded.
    return out[:B] if B_pad != B else out


def init_params(key, hidden, discr_size, out_size):
    """Synthetic parameters (PyTorch Linear convention y = x @ W + b, W stored
    already transposed to [in, out])."""
    ks = jax.random.split(key, 6)
    s = 0.1
    return {
        "w1": jax.random.normal(ks[0], (3, hidden), jnp.float32) * s,
        "b1": jax.random.normal(ks[5], (1, hidden), jnp.float32) * s,
        "w2": jax.random.normal(ks[1], (hidden, hidden), jnp.float32) * s,
        "b2": jnp.zeros((1, hidden), jnp.float32),
        "w3": jax.random.normal(ks[2], (hidden, HIDDE_SIZE_OUT), jnp.float32) * s,
        "b3": jnp.zeros((1, HIDDE_SIZE_OUT), jnp.float32),
        "emb": jax.random.normal(ks[3], (discr_size, HIDDE_SIZE_OUT), jnp.float32) * s,
        "wo": jax.random.normal(ks[4], (HIDDE_SIZE_OUT, out_size), jnp.float32) * s,
        "bo": jax.random.normal(ks[5], (1, out_size), jnp.float32) * s,
    }


def critic_net_ref(x, params):
    """Pure-JAX reference of the unfolded PyTorch forward (for verification)."""
    conti_x_a = jnp.concatenate([x[:, 0:2], x[:, 3:4]], axis=1)
    h = jnp.maximum(conti_x_a @ params["w1"] + params["b1"], 0.0)
    h = jnp.maximum(h @ params["w2"] + params["b2"], 0.0)
    h_conti = h @ params["w3"] + params["b3"]
    idx = x[:, 2].astype(jnp.int32)
    h_discr = params["emb"][idx]
    return (h_conti + h_discr) @ params["wo"] + params["bo"]


def _make_inputs(key, B, discr_size):
    cont = jax.random.normal(key, (B, 2), jnp.float32)
    discr = jax.random.randint(jax.random.fold_in(key, 1), (B, 1), 0,
                               discr_size).astype(jnp.float32)
    act = jax.random.normal(jax.random.fold_in(key, 2), (B, 1), jnp.float32)
    return jnp.concatenate([cont, discr, act], axis=1)   # [B, 4]


if __name__ == "__main__":
    HIDDEN = 32      # hidde_size
    DISCR_SIZE = 5   # discrete states (embedding rows)
    OUT_SIZE = 1     # critic scalar Q-value

    key = jax.random.PRNGKey(0)
    kx, kp = jax.random.split(key)
    params = init_params(kp, HIDDEN, DISCR_SIZE, OUT_SIZE)

    # Fold once, reuse for every forward (hoisted out of the jitted hot path).
    fp = fold_params(params, DISCR_SIZE)

    # Tolerance loosened vs. pure-f32 because the HxH matmul runs with bf16
    # operands (accumulation stays f32).
    ATOL = 1e-2
    RTOL = 1e-2

    # Small batch (single grid step).
    x_small = _make_inputs(kx, 8, DISCR_SIZE)
    out_small = jax.block_until_ready(
        critic_net_forward(x_small, fp, discr_size=DISCR_SIZE))
    ref_small = critic_net_ref(x_small, params)
    assert out_small.shape == (8, OUT_SIZE)
    assert jnp.allclose(out_small, ref_small, atol=ATOL, rtol=RTOL), "mismatch (B=8)"

    # Larger batch exercising batch padding + 2-step parallel grid (megacore).
    x_big = _make_inputs(jax.random.fold_in(kx, 7), 600, DISCR_SIZE)
    out_big = jax.block_until_ready(
        critic_net_forward(x_big, fp, discr_size=DISCR_SIZE))
    ref_big = critic_net_ref(x_big, params)
    assert out_big.shape == (600, OUT_SIZE)
    assert jnp.allclose(out_big, ref_big, atol=ATOL, rtol=RTOL), "mismatch (B=600)"

    print("KERNEL_OK")
</pallas_src>

<mosaic_0001>
module attributes {stable_mosaic.version = 11 : i64} {
  func.func @critic_kernel(%arg0: i32, %arg1: memref<8x4xf32, #tpu.memory_space<vmem>>, %arg2: memref<4x32xf32, #tpu.memory_space<vmem>>, %arg3: memref<32x32xbf16, #tpu.memory_space<vmem>>, %arg4: memref<1x32xf32, #tpu.memory_space<vmem>>, %arg5: memref<32x1xf32, #tpu.memory_space<vmem>>, %arg6: memref<8x1xf32, #tpu.memory_space<vmem>>, %arg7: memref<8x1xf32, #tpu.memory_space<vmem>>) attributes {dimension_semantics = [#tpu.dimension_semantics<parallel>], iteration_bounds = array<i64: 1>, scalar_prefetch = 0 : i64, scratch_operands = 0 : i64, tpu.core_type = #tpu.core_type<tc>, window_params = [{transform_indices = @transform_0, window_bounds = array<i64: 8, 4>}, {pipeline_mode = #tpu.pipeline_mode<synchronous>, transform_indices = @transform_1, window_bounds = array<i64: 4, 32>}, {pipeline_mode = #tpu.pipeline_mode<synchronous>, transform_indices = @transform_2, window_bounds = array<i64: 32, 32>}, {pipeline_mode = #tpu.pipeline_mode<synchronous>, transform_indices = @transform_3, window_bounds = array<i64: 1, 32>}, {pipeline_mode = #tpu.pipeline_mode<synchronous>, transform_indices = @transform_4, window_bounds = array<i64: 32, 1>}, {pipeline_mode = #tpu.pipeline_mode<synchronous>, transform_indices = @transform_5, window_bounds = array<i64: 8, 1>}, {transform_indices = @transform_6, window_bounds = array<i64: 8, 1>}]} {
    %c0 = arith.constant 0 : index
    %c0_0 = arith.constant 0 : index
    %0 = vector.load %arg1[%c0, %c0_0] : memref<8x4xf32, #tpu.memory_space<vmem>>, vector<8x4xf32>
    %1 = vector.extract_strided_slice %0 {offsets = [0, 2], sizes = [8, 1], strides = [1, 1]} : vector<8x4xf32> to vector<8x1xf32>
    %cst = arith.constant 0.000000e+00 : f32
    %cst_1 = arith.constant 4.000000e+00 : f32
    %2 = vector.broadcast %cst : f32 to vector<8x1xf32>
    %3 = arith.maximumf %2, %1 : vector<8x1xf32>
    %4 = vector.broadcast %cst_1 : f32 to vector<8x1xf32>
    %5 = arith.minimumf %4, %3 : vector<8x1xf32>
    %6 = arith.fptosi %5 : vector<8x1xf32> to vector<8x1xi32>
    %7 = tpu.iota {dimensions = array<i32: 1>} : vector<8x4xi32>
    %c2_i32 = arith.constant 2 : i32
    %8 = vector.broadcast %c2_i32 : i32 to vector<8x4xi32>
    %9 = arith.cmpi eq, %7, %8 : vector<8x4xi32>
    %cst_2 = arith.constant 1.000000e+00 : f32
    %10 = vector.broadcast %cst_2 : f32 to vector<8x4xf32>
    %11 = arith.select %9, %10, %0 : vector<8x4xi1>, vector<8x4xf32>
    %c0_3 = arith.constant 0 : index
    %c0_4 = arith.constant 0 : index
    %12 = vector.load %arg2[%c0_3, %c0_4] : memref<4x32xf32, #tpu.memory_space<vmem>>, vector<4x32xf32>
    %cst_5 = arith.constant dense<0.000000e+00> : vector<8x32xf32>
    %13 = tpu.matmul %11, %12, %cst_5 {dimension_numbers = #tpu.dot_dimension_numbers<[1], [0], [0], [1], [0, 0, 1, 1], [], []>} : vector<8x4xf32>, vector<4x32xf32>, vector<8x32xf32> -> vector<8x32xf32>
    %cst_6 = arith.constant 0.000000e+00 : f32
    %14 = vector.broadcast %cst_6 : f32 to vector<8x32xf32>
    %15 = arith.maximumf %13, %14 : vector<8x32xf32>
    %16 = arith.truncf %15 : vector<8x32xf32> to vector<8x32xbf16>
    %c0_7 = arith.constant 0 : index
    %c0_8 = arith.constant 0 : index
    %17 = vector.load %arg3[%c0_7, %c0_8] : memref<32x32xbf16, #tpu.memory_space<vmem>>, vector<32x32xbf16>
    %cst_9 = arith.constant dense<0.000000e+00> : vector<8x32xf32>
    %18 = tpu.matmul %16, %17, %cst_9 {dimension_numbers = #tpu.dot_dimension_numbers<[1], [0], [0], [1], [0, 0, 1, 1], [], []>} : vector<8x32xbf16>, vector<32x32xbf16>, vector<8x32xf32> -> vector<8x32xf32>
    %c0_10 = arith.constant 0 : index
    %c0_11 = arith.constant 0 : index
    %19 = vector.load %arg4[%c0_10, %c0_11] : memref<1x32xf32, #tpu.memory_space<vmem>>, vector<1x32xf32>
    %20 = vector.broadcast %19 : vector<1x32xf32> to vector<8x32xf32>
    %21 = arith.addf %18, %20 : vector<8x32xf32>
    %cst_12 = arith.constant 0.000000e+00 : f32
    %22 = vector.broadcast %cst_12 : f32 to vector<8x32xf32>
    %23 = arith.maximumf %21, %22 : vector<8x32xf32>
    %c0_13 = arith.constant 0 : index
    %c0_14 = arith.constant 0 : index
    %24 = vector.load %arg5[%c0_13, %c0_14] : memref<32x1xf32, #tpu.memory_space<vmem>>, vector<32x1xf32>
    %cst_15 = arith.constant dense<0.000000e+00> : vector<8x1xf32>
    %25 = tpu.matmul %23, %24, %cst_15 {dimension_numbers = #tpu.dot_dimension_numbers<[1], [0], [0], [1], [0, 0, 1, 1], [], []>} : vector<8x32xf32>, vector<32x1xf32>, vector<8x1xf32> -> vector<8x1xf32>
    %26 = tpu.iota {dimensions = array<i32: 1>} : vector<8x8xi32>
    %27 = vector.broadcast %6 : vector<8x1xi32> to vector<8x8xi32>
    %28 = arith.cmpi eq, %26, %27 : vector<8x8xi32>
    %29 = arith.extui %28 : vector<8x8xi1> to vector<8x8xi32>
    %30 = arith.sitofp %29 : vector<8x8xi32> to vector<8x8xf32>
    %c0_16 = arith.constant 0 : index
    %c0_17 = arith.constant 0 : index
    %31 = vector.load %arg6[%c0_16, %c0_17] : memref<8x1xf32, #tpu.memory_space<vmem>>, vector<8x1xf32>
    %cst_18 = arith.constant dense<0.000000e+00> : vector<8x1xf32>
    %32 = tpu.matmul %30, %31, %cst_18 {dimension_numbers = #tpu.dot_dimension_numbers<[1], [0], [0], [1], [0, 0, 1, 1], [], []>} : vector<8x8xf32>, vector<8x1xf32>, vector<8x1xf32> -> vector<8x1xf32>
    %33 = arith.addf %25, %32 : vector<8x1xf32>
    %c0_19 = arith.constant 0 : index
    %c0_20 = arith.constant 0 : index
    %34 = vector.load %arg7[%c0_19, %c0_20] : memref<8x1xf32, #tpu.memory_space<vmem>>, vector<8x1xf32>
    tpu.vector_store %arg7[%c0_19, %c0_20], %33 {strides = array<i32>} : memref<8x1xf32, #tpu.memory_space<vmem>>, vector<8x1xf32>,
    return
  }
  func.func @transform_0(%arg0: i32) -> (i32, i32) {
    %c0_i32 = arith.constant 0 : i32
    %c0_i32_0 = arith.constant 0 : i32
    return %arg0, %c0_i32 : i32, i32
  }
  func.func @transform_1(%arg0: i32) -> (i32, i32) {
    %c0_i32 = arith.constant 0 : i32
    %c0_i32_0 = arith.constant 0 : i32
    %c0_i32_1 = arith.constant 0 : i32
    return %c0_i32, %c0_i32_0 : i32, i32
  }
  func.func @transform_2(%arg0: i32) -> (i32, i32) {
    %c0_i32 = arith.constant 0 : i32
    %c0_i32_0 = arith.constant 0 : i32
    %c0_i32_1 = arith.constant 0 : i32
    return %c0_i32, %c0_i32_0 : i32, i32
  }
  func.func @transform_3(%arg0: i32) -> (i32, i32) {
    %c0_i32 = arith.constant 0 : i32
    %c0_i32_0 = arith.constant 0 : i32
    %c0_i32_1 = arith.constant 0 : i32
    return %c0_i32, %c0_i32_0 : i32, i32
  }
  func.func @transform_4(%arg0: i32) -> (i32, i32) {
    %c0_i32 = arith.constant 0 : i32
    %c0_i32_0 = arith.constant 0 : i32
    %c0_i32_1 = arith.constant 0 : i32
    return %c0_i32, %c0_i32_0 : i32, i32
  }
  func.func @transform_5(%arg0: i32) -> (i32, i32) {
    %c0_i32 = arith.constant 0 : i32
    %c0_i32_0 = arith.constant 0 : i32
    %c0_i32_1 = arith.constant 0 : i32
    return %c0_i32, %c0_i32_0 : i32, i32
  }
  func.func @transform_6(%arg0: i32) -> (i32, i32) {
    %c0_i32 = arith.constant 0 : i32
    %c0_i32_0 = arith.constant 0 : i32
    return %arg0, %c0_i32 : i32, i32
  }
}

</mosaic_0001>

<bundles_post_ra>
// kernel: critic_net_forward.1
= control target key start
LH: loop header
LB: loop body
LE: loop exit
PB: predicated region body
PF: predicated region fallthrough
CT: control target
= control target key end

     0   :  { %vm37_vm0 = vcmask 1043456   ;;  %v28_v0 = vlaneseq  ;;  %vm33_vm1 = vcmask 31744   ;;  %v190_v12 = vmov 2   ;;  %s262_s1 = inlined_call_operand.vmem [shape: f32[4,32], index: 1, kind: input, shape index: {}]   ;;  %s263_s0 = inlined_call_operand.vmem [shape: f32[8,4], index: 0, kind: input, shape index: {}]   ;;  %s264_s2 = inlined_call_operand.vmem [shape: bf16[32,32], index: 2, kind: input, shape index: {}]   ;;  %s265_s3 = inlined_call_operand.vmem [shape: f32[1,32], index: 3, kind: input, shape index: {}]   ;;  %s266_s4 = inlined_call_operand.vmem [shape: f32[32,1], index: 4, kind: input, shape index: {}]   ;;  %s267_s5 = inlined_call_operand.vmem [shape: f32[8,1], index: 5, kind: input, shape index: {}]   ;;  %s268_s6 = inlined_call_operand.vmem [shape: f32[8,1], index: 6, kind: output, shape index: {}]  }
   0x1   :  { %v32_v1 = vld [vmem:[%s262_s1] sm:$0xf]  ;;  %v180_v2 = vld [vmem:[%s264_s2 + $0x8] sm:$0xff]  ;;  %v104_v11 = vld [vmem:[%s266_s4 + $0x18] sm:$0xff]  ;;  %188 = vset.pattern.permute.xlu0 %v190_v12  ;;  %vm83_vm4 = vcmask 261120   ;;  %vm112_vm6 = vcmask 64512  }
   0x2   :  { %165 = vmatpush.msk.msra.mxu0 %vm37_vm0, %v32_v1  ;;  %v24_v3 = vld [vmem:[%s263_s0] sm:$0xff]  ;;  %v29_v4 = vand.u32 127, %v28_v0  ;;  %93 = vmatpush.bf16.msra.mxu1 %v180_v2  ;;  %v103_v18 = vld [vmem:[%s266_s4 + $0x10] sm:$0xff]  ;;  %v102_v19 = vld [vmem:[%s266_s4 + $0x8] sm:$0xff]  ;;  %v191_v23 = vmov 0.0   ;;  %vm159_vm7 = vcmask 7168  }
   0x3   :  { %v25_v6 = vmax.f32 %v24_v3, 0.0  ;;  %v179_v7 = vld [vmem:[%s264_s2] sm:$0xff]  ;;  %151 = vmatpush.msra.mxu3 %v104_v11 }
   0x4   :  { %vm30_vm2 = vcmp.eq.s32.totalorder %v29_v4, 2  ;;  %v111_v21 = vld [vmem:[%s267_s5] sm:$0xff] }
   0x5   :  { %v31_v5 = vsel %vm30_vm2, 1.0, %v24_v3  ;;  %v26_v8 = vmin.f32 %v25_v6, 4.0  ;;  %152 = vmatpush.msra.mxu3 %v103_v18  ;;  %v101_v22 = vld [vmem:[%s266_s4] sm:$0xff]  ;;  %131 = vmatpush.msra.mxu2 %v111_v21 }
   0x6   :  { %166 = vmatmul.msk.f32.vlgmr.msra.gmra.mxu0 %vm33_vm1, %v31_v5  ;;  %94 = vmatpush.bf16.msra.mxu1 %v179_v7  ;;  %v189_v25 = vld [vmem:[%s265_s3] ss:$0 sm:$0xff] }
   0x7   :  { %vm181_vm3 = vcmp.lt.s32.totalorder %v26_v8, 0  ;;  %v182_v9 = vceil.f32 %v26_v8  ;;  %v183_v10 = vfloor.f32 %v26_v8  ;;  %153 = vmatpush.msra.mxu3 %v102_v19 }
   0x9   :  { %v184_v13 = vsel %vm181_vm3, %v182_v9, %v183_v10  ;;  %154 = vmatpush.msra.mxu3 %v101_v22 }
   0xa   :  { %v185_v14 = vcvt.f32.s32 %v184_v13 }
   0xc   :  { %106 = vperm.xlu0 %188, %v185_v14  }
  0x7e   :  { %v107_v20 = vpop.permute.xlu0 %106 }
  0x7f   :  { %vm108_vm5 = vcmp.eq.s32.totalorder %v29_v4, %v107_v20 }
  0x80   :  { %v176_v24 = vsel %vm108_vm5, 1.0, %v191_v23 }
  0x81   :  { %177 = vmatmul.msk.f32.vlgmr.msra.gmra.mxu2 %vm112_vm6, %v176_v24 }
  0x83   :  { %v58_v15 = vpop.f32.mrf.mxu0 }
  0x84   :  { %v61_v16 = vmax.f32 %v58_v15, 0.0 }
  0x86   :  { %v62_v17 = vpack.c.bf16 %v61_v16, %v61_v16 }
  0x88   :  { %175 = vmatmul.msk.bf16.vlgmr.msra.gmra.mxu1 %vm83_vm4, %v62_v17 }
 0x104   :  { %v133_v30 = vpop.f32.mrf.mxu2 }
 0x105   :  { %v96_v26 = vpop.f32.mrf.mxu1 }
 0x106   :  { %v97_v27 = vadd.f32 %v189_v25, %v96_v26 }
 0x108   :  { %v100_v28 = vmax.f32 %v97_v27, 0.0 }
 0x10a   :  { %178 = vmatmul.msk.f32.vlgmr.msra.gmra.mxu3 %vm83_vm4, %v100_v28 }
 0x10d   :  { %v98_v29 = vpop.f32.mrf.mxu1 }
 0x18d   :  { %v156_v31 = vpop.f32.mrf.mxu3 }
 0x18e   :  { %v157_v32 = vadd.f32 %v156_v31, %v133_v30 }
 0x190   :  { %160 = vst.msk [vmem:[%s268_s6] sm:$0xff] %vm159_vm7, %v157_v32 }

</bundles_post_ra>
